<compile_context>
chip_gen: v5e
topology: v5e:2x2
jax: 0.10.0
libtpu: 0.0.40
codegen_flags: <defaults>
</compile_context>

<pallas_src>
import functools

import jax
import jax.numpy as jnp
from jax.experimental import pallas as pl
from jax.experimental.pallas import tpu as pltpu


def _soft_ce_kernel(s_ref, t_ref, o_ref, acc_ref, *,
                    inv_temperature, eps, inv_batch, batch, needs_mask):
    c = pl.program_id(0)            # TensorCore split (parallel axis)
    i = pl.program_id(1)            # batch-tile index within this core

    @pl.when(i == 0)
    def _init():
        acc_ref[0, 0] = jnp.float32(0.0)

    # Upcast in-kernel (narrow dtype travels through the DMA); "/ T" replaced
    # by a precomputed 1/T multiply.
    s = s_ref[...].astype(jnp.float32) * inv_temperature
    t = t_ref[...].astype(jnp.float32) * inv_temperature

    # Teacher softmax over the class axis (lanes).  Exact reciprocal: it only
    # acts on a (TB, 1) vector, so the approx path would add error for zero
    # measurable speedup.
    t_max = jnp.max(t, axis=-1, keepdims=True)
    t_exp = jnp.exp(t - t_max)
    t_inv = 1.0 / jnp.sum(t_exp, axis=-1, keepdims=True)
    t_prob = t_exp * t_inv                                  # eps folded below

    # Student negative log-softmax over the class axis.
    s_max = jnp.max(s, axis=-1, keepdims=True)
    s_shift = s - s_max
    s_lse = jnp.log(jnp.sum(jnp.exp(s_shift), axis=-1, keepdims=True))
    s_neg_log_prob = s_lse - s_shift                        # eps folded below

    # Fold the two full-tile "+ eps" adds into per-row corrections:
    #   sum_c (a + eps)(p + eps) = sum(a*p) + eps*sum(a) + eps*sum(p) + eps^2*C
    # with sum(p) == 1 per row by construction of the softmax.
    num_classes = s_ref.shape[-1]
    row_dot = jnp.sum(s_neg_log_prob * t_prob, axis=-1, keepdims=True)
    row_neg_logp = jnp.sum(s_neg_log_prob, axis=-1, keepdims=True)
    row_total = row_dot + eps * row_neg_logp + (eps + eps * eps * num_classes)

    if needs_mask:
        # Row-level (TB,1) mask only.  Padded / duplicated rows may hold
        # garbage (NaN/Inf) but every reduction above is per-row, so the
        # damage stays confined to invalid rows and is zeroed here.
        # NOTE: this invariant breaks if a cross-row (column) reduction is
        # ever added — re-introduce full-tile sanitization in that case.
        blk_rows = s_ref.shape[0]
        blk = c * pl.num_programs(1) + i            # unclamped global tile id
        row = blk * blk_rows + jax.lax.broadcasted_iota(
            jnp.int32, (blk_rows, 1), 0)
        row_total = jnp.where(row < batch, row_total, 0.0)

    acc_ref[0, 0] += jnp.sum(row_total)

    @pl.when(i == pl.num_programs(1) - 1)
    def _finalize():
        o_ref[0, 0] = acc_ref[0, 0] * inv_batch


def _vmem_capacity_bytes():
    """Physical VMEM per TensorCore; conservative fallback = v7x (64 MiB)."""
    try:
        info = pltpu.get_tpu_info()
        cap = getattr(info, "vmem_capacity_bytes", None)
        if cap:
            return int(cap)
    except Exception:
        pass
    return 64 * 1024 * 1024


def _choose_tiling(batch, num_classes, itemsize):
    """Pick (block_rows, vmem_limit_bytes), generation-aware.

    Budgets the 2 inputs x 2 pipeline buffers (caller dtype) PLUS the live f32
    intermediates created by the in-kernel upcast (~4 x C x 4B per row).
    """
    cap = _vmem_capacity_bytes()
    budget = min((3 * cap) // 8, 48 * 1024 * 1024)   # ~48 MiB v5e/v6e, 24 MiB v7x
    per_row = 4 * num_classes * itemsize + 4 * num_classes * 4
    tb = budget // max(per_row, 1)
    tb = int(min(tb, 512))              # 512-row tiles already ~85% HBM roofline
    tb = max(8, (tb // 8) * 8)          # sublane multiple
    tb = min(tb, max(8, -(-batch // 8) * 8))   # never larger than (padded) batch
    vmem_limit = tb * per_row + (8 << 20)
    vmem_limit = int(min(max(vmem_limit, 16 << 20), (3 * cap) // 4))
    return tb, vmem_limit


def soft_crossentropy_loss(student_logits, teacher_logits, temperature=5,
                           reduction="mean", block_rows=None):
    assert student_logits.shape == teacher_logits.shape
    assert student_logits.ndim == 2
    B, C = student_logits.shape
    eps = 1e-07
    inv_batch = (1.0 / B) if reduction == "mean" else 1.0

    s_bytes = jnp.dtype(student_logits.dtype).itemsize
    t_bytes = jnp.dtype(teacher_logits.dtype).itemsize
    itemsize = max(s_bytes, t_bytes)
    tb, vmem_limit = _choose_tiling(B, C, itemsize)
    if block_rows is not None:
        tb = int(block_rows)
        vmem_limit = max(vmem_limit,
                         4 * tb * C * itemsize + 4 * tb * C * 4 + (8 << 20))

    nb_total = pl.cdiv(B, tb)                       # number of batch tiles
    # Split the batch tiles across (up to) two TensorCores; the outer grid
    # axis is "parallel" so v7x's megacore shards it, v5e/v6e run it serially.
    n_cores = 2 if nb_total >= 2 else 1
    nb_per_core = pl.cdiv(nb_total, n_cores)
    # Mask whenever the grid covers more rows than B (ragged last tile and/or
    # a duplicated tile on the last core when nb_total is odd).
    needs_mask = (n_cores * nb_per_core * tb) != B

    def in_index_map(c, i):
        # Clamp so a possible duplicate step on the last core re-reads an
        # in-bounds tile; its rows are masked to zero inside the kernel.
        return (jnp.minimum(c * nb_per_core + i, nb_total - 1), 0)

    kernel = functools.partial(
        _soft_ce_kernel,
        inv_temperature=1.0 / float(temperature),
        eps=eps,
        inv_batch=inv_batch,
        batch=B,
        needs_mask=needs_mask,
    )

    cost = pl.CostEstimate(
        flops=20 * B * C,
        transcendentals=2 * B * C,                  # two exps per element
        bytes_accessed=B * C * (s_bytes + t_bytes) + 4 * n_cores,
    )

    partials = pl.pallas_call(
        kernel,
        out_shape=jax.ShapeDtypeStruct((n_cores, 1), jnp.float32),
        grid=(n_cores, nb_per_core),
        in_specs=[
            pl.BlockSpec((tb, C), in_index_map),
            pl.BlockSpec((tb, C), in_index_map),
        ],
        out_specs=pl.BlockSpec((1, 1), lambda c, i: (c, 0),
                               memory_space=pltpu.MemorySpace.SMEM),
        scratch_shapes=[pltpu.SMEM((1, 1), jnp.float32)],
        compiler_params=pltpu.CompilerParams(
            dimension_semantics=("parallel", "arbitrary"),
            vmem_limit_bytes=vmem_limit,
        ),
        cost_estimate=cost,
    )(student_logits, teacher_logits)
    return jnp.sum(partials)


def _reference(student_logits, teacher_logits, temperature=5, reduction="mean"):
    eps = 1e-07
    s32 = student_logits.astype(jnp.float32)
    t32 = teacher_logits.astype(jnp.float32)
    t = jax.nn.softmax(t32 / temperature, axis=1) + eps
    s = -jax.nn.log_softmax(s32 / temperature, axis=1) + eps
    loss = jnp.sum(s * t)
    if reduction == "mean":
        loss = loss / student_logits.shape[0]
    return loss


if __name__ == "__main__":
    key = jax.random.PRNGKey(0)
    k1, k2, k3, k4, k5, k6 = jax.random.split(key, 6)

    # Case 1: small f32 inputs, single tile / single core.
    B1, C1 = 8, 32
    s1 = jax.random.normal(k1, (B1, C1), dtype=jnp.float32) * 3.0
    t1 = jax.random.normal(k2, (B1, C1), dtype=jnp.float32) * 3.0
    out1 = jax.block_until_ready(soft_crossentropy_loss(s1, t1, temperature=5))
    ref1 = _reference(s1, t1, temperature=5)
    assert jnp.allclose(out1, ref1, rtol=2e-3, atol=2e-3), (out1, ref1)

    # Case 2: bf16 inputs, 2-core split with an odd tile count (duplicate-tile
    # clamp) and a ragged last tile (row-mask path).
    B2, C2 = 130, 256
    s2 = (jax.random.normal(k3, (B2, C2), jnp.float32) * 2.0).astype(jnp.bfloat16)
    t2 = (jax.random.normal(k4, (B2, C2), jnp.float32) * 2.0).astype(jnp.bfloat16)
    out2 = jax.block_until_ready(
        soft_crossentropy_loss(s2, t2, temperature=5, block_rows=64))
    ref2 = _reference(s2, t2, temperature=5)
    assert jnp.allclose(out2, ref2, rtol=2e-3, atol=2e-3), (out2, ref2)

    # Case 3: reduction='sum', multi-step accumulation on both cores, no mask.
    B3, C3 = 64, 128
    s3 = jax.random.normal(k5, (B3, C3), dtype=jnp.float32)
    t3 = jax.random.normal(k6, (B3, C3), dtype=jnp.float32)
    out3 = jax.block_until_ready(
        soft_crossentropy_loss(s3, t3, temperature=5, reduction="sum",
                               block_rows=16))
    ref3 = _reference(s3, t3, temperature=5, reduction="sum")
    assert jnp.allclose(out3, ref3, rtol=2e-3, atol=2e-3), (out3, ref3)

    print("KERNEL_OK")
</pallas_src>

<mosaic_0001>
module attributes {stable_mosaic.version = 11 : i64} {
  func.func @_soft_ce_kernel(%arg0: i32, %arg1: i32, %arg2: memref<8x32xf32, #tpu.memory_space<vmem>>, %arg3: memref<8x32xf32, #tpu.memory_space<vmem>>, %arg4: memref<1x1xf32, #tpu.memory_space<smem>>, %arg5: memref<1x1xf32, #tpu.memory_space<smem>>) attributes {dimension_semantics = [#tpu.dimension_semantics<parallel>, #tpu.dimension_semantics<arbitrary>], iteration_bounds = array<i64: 1, 1>, scalar_prefetch = 0 : i64, scratch_operands = 1 : i64, tpu.core_type = #tpu.core_type<tc>, window_params = [{transform_indices = @transform_0, window_bounds = array<i64: 8, 32>}, {transform_indices = @transform_1, window_bounds = array<i64: 8, 32>}, {transform_indices = @transform_2, window_bounds = array<i64: 1, 1>}]} {
    %c0_i32 = arith.constant 0 : i32
    %0 = arith.cmpi eq, %arg1, %c0_i32 : i32
    %1 = arith.extui %0 : i1 to i32
    %c0_i32_0 = arith.constant 0 : i32
    %2 = arith.cmpi ne, %1, %c0_i32_0 : i32
    scf.if %2 {
      %cst_21 = arith.constant 0.000000e+00 : f32
      %c0_22 = arith.constant 0 : index
      %c0_23 = arith.constant 0 : index
      %50 = memref.load %arg5[%c0_22, %c0_23] : memref<1x1xf32, #tpu.memory_space<smem>>
      memref.store %cst_21, %arg5[%c0_22, %c0_23] : memref<1x1xf32, #tpu.memory_space<smem>>
    } else {
    }
    %c0 = arith.constant 0 : index
    %c0_1 = arith.constant 0 : index
    %3 = vector.load %arg2[%c0, %c0_1] : memref<8x32xf32, #tpu.memory_space<vmem>>, vector<8x32xf32>
    %cst = arith.constant 2.000000e-01 : f32
    %4 = vector.broadcast %cst : f32 to vector<8x32xf32>
    %5 = arith.mulf %3, %4 : vector<8x32xf32>
    %c0_2 = arith.constant 0 : index
    %c0_3 = arith.constant 0 : index
    %6 = vector.load %arg3[%c0_2, %c0_3] : memref<8x32xf32, #tpu.memory_space<vmem>>, vector<8x32xf32>
    %cst_4 = arith.constant 2.000000e-01 : f32
    %7 = vector.broadcast %cst_4 : f32 to vector<8x32xf32>
    %8 = arith.mulf %6, %7 : vector<8x32xf32>
    %cst_5 = arith.constant dense<0xFF800000> : vector<8xf32>
    %9 = vector.multi_reduction <maximumf>, %8, %cst_5 [1] : vector<8x32xf32> to vector<8xf32>
    %10 = vector.shape_cast %9 : vector<8xf32> to vector<8x1xf32>
    %11 = vector.broadcast %10 : vector<8x1xf32> to vector<8x32xf32>
    %12 = arith.subf %8, %11 : vector<8x32xf32>
    %13 = math.exp %12 : vector<8x32xf32>
    %cst_6 = arith.constant dense<0.000000e+00> : vector<8xf32>
    %14 = vector.multi_reduction <add>, %13, %cst_6 [1] : vector<8x32xf32> to vector<8xf32>
    %15 = vector.shape_cast %14 : vector<8xf32> to vector<8x1xf32>
    %cst_7 = arith.constant 1.000000e+00 : f32
    %16 = vector.broadcast %cst_7 : f32 to vector<8x1xf32>
    %17 = arith.divf %16, %15 : vector<8x1xf32>
    %18 = vector.broadcast %17 : vector<8x1xf32> to vector<8x32xf32>
    %19 = arith.mulf %13, %18 : vector<8x32xf32>
    %cst_8 = arith.constant dense<0xFF800000> : vector<8xf32>
    %20 = vector.multi_reduction <maximumf>, %5, %cst_8 [1] : vector<8x32xf32> to vector<8xf32>
    %21 = vector.shape_cast %20 : vector<8xf32> to vector<8x1xf32>
    %22 = vector.broadcast %21 : vector<8x1xf32> to vector<8x32xf32>
    %23 = arith.subf %5, %22 : vector<8x32xf32>
    %24 = math.exp %23 : vector<8x32xf32>
    %cst_9 = arith.constant dense<0.000000e+00> : vector<8xf32>
    %25 = vector.multi_reduction <add>, %24, %cst_9 [1] : vector<8x32xf32> to vector<8xf32>
    %26 = vector.shape_cast %25 : vector<8xf32> to vector<8x1xf32>
    %27 = math.log %26 : vector<8x1xf32>
    %28 = vector.broadcast %27 : vector<8x1xf32> to vector<8x32xf32>
    %29 = arith.subf %28, %23 : vector<8x32xf32>
    %30 = arith.mulf %29, %19 : vector<8x32xf32>
    %cst_10 = arith.constant dense<0.000000e+00> : vector<8xf32>
    %31 = vector.multi_reduction <add>, %30, %cst_10 [1] : vector<8x32xf32> to vector<8xf32>
    %32 = vector.shape_cast %31 : vector<8xf32> to vector<8x1xf32>
    %cst_11 = arith.constant dense<0.000000e+00> : vector<8xf32>
    %33 = vector.multi_reduction <add>, %29, %cst_11 [1] : vector<8x32xf32> to vector<8xf32>
    %34 = vector.shape_cast %33 : vector<8xf32> to vector<8x1xf32>
    %cst_12 = arith.constant 1.000000e-07 : f32
    %35 = vector.broadcast %cst_12 : f32 to vector<8x1xf32>
    %36 = arith.mulf %35, %34 : vector<8x1xf32>
    %37 = arith.addf %32, %36 : vector<8x1xf32>
    %cst_13 = arith.constant 1.00000321E-7 : f32
    %38 = vector.broadcast %cst_13 : f32 to vector<8x1xf32>
    %39 = arith.addf %37, %38 : vector<8x1xf32>
    %c0_14 = arith.constant 0 : index
    %c0_15 = arith.constant 0 : index
    %40 = memref.load %arg5[%c0_14, %c0_15] : memref<1x1xf32, #tpu.memory_space<smem>>
    %41 = vector.shape_cast %39 : vector<8x1xf32> to vector<1x8x1xf32>
    %cst_16 = arith.constant dense<0.000000e+00> : vector<1xf32>
    %42 = vector.multi_reduction <add>, %41, %cst_16 [1, 2] : vector<1x8x1xf32> to vector<1xf32>
    %43 = vector.shape_cast %42 : vector<1xf32> to vector<1x1x1xf32>
    %44 = vector.extract %43[0, 0, 0] : f32 from vector<1x1x1xf32>
    %45 = arith.addf %40, %44 : f32
    %c0_17 = arith.constant 0 : index
    %c0_18 = arith.constant 0 : index
    %46 = memref.load %arg5[%c0_17, %c0_18] : memref<1x1xf32, #tpu.memory_space<smem>>
    memref.store %45, %arg5[%c0_17, %c0_18] : memref<1x1xf32, #tpu.memory_space<smem>>
    %c0_i32_19 = arith.constant 0 : i32
    %47 = arith.cmpi eq, %arg1, %c0_i32_19 : i32
    %48 = arith.extui %47 : i1 to i32
    %c0_i32_20 = arith.constant 0 : i32
    %49 = arith.cmpi ne, %48, %c0_i32_20 : i32
    scf.if %49 {
      %c0_21 = arith.constant 0 : index
      %c0_22 = arith.constant 0 : index
      %50 = memref.load %arg5[%c0_21, %c0_22] : memref<1x1xf32, #tpu.memory_space<smem>>
      %cst_23 = arith.constant 1.250000e-01 : f32
      %51 = arith.mulf %50, %cst_23 : f32
      %c0_24 = arith.constant 0 : index
      %c0_25 = arith.constant 0 : index
      %52 = memref.load %arg4[%c0_24, %c0_25] : memref<1x1xf32, #tpu.memory_space<smem>>
      memref.store %51, %arg4[%c0_24, %c0_25] : memref<1x1xf32, #tpu.memory_space<smem>>
    } else {
    }
    return
  }
  func.func @transform_0(%arg0: i32, %arg1: i32) -> (i32, i32) {
    %c1_i32 = arith.constant 1 : i32
    %0 = arith.muli %arg0, %c1_i32 : i32
    %1 = arith.addi %0, %arg1 : i32
    %c0_i32 = arith.constant 0 : i32
    %2 = arith.minsi %1, %c0_i32 : i32
    %c0_i32_0 = arith.constant 0 : i32
    %c0_i32_1 = arith.constant 0 : i32
    return %2, %c0_i32_0 : i32, i32
  }
  func.func @transform_1(%arg0: i32, %arg1: i32) -> (i32, i32) {
    %c1_i32 = arith.constant 1 : i32
    %0 = arith.muli %arg0, %c1_i32 : i32
    %1 = arith.addi %0, %arg1 : i32
    %c0_i32 = arith.constant 0 : i32
    %2 = arith.minsi %1, %c0_i32 : i32
    %c0_i32_0 = arith.constant 0 : i32
    %c0_i32_1 = arith.constant 0 : i32
    return %2, %c0_i32_0 : i32, i32
  }
  func.func @transform_2(%arg0: i32, %arg1: i32) -> (i32, i32) {
    %c0_i32 = arith.constant 0 : i32
    %c0_i32_0 = arith.constant 0 : i32
    return %arg0, %c0_i32 : i32, i32
  }
}

</mosaic_0001>

<bundles_post_ra>
// kernel: tpu_custom_call.1
= control target key start
LH: loop header
LB: loop body
LE: loop exit
PB: predicated region body
PF: predicated region fallthrough
CT: control target
= control target key end

     0   :  { %7 = vsyncpa [#allocation4], 0  ;;  %s269_s0 = inlined_call_operand.hbm [shape: f32[8,32], index: 0, kind: input, shape index: {}]   ;;  %s270_s1 = inlined_call_operand.hbm [shape: f32[8,32], index: 1, kind: input, shape index: {}]   ;;  %s271_s2 = inlined_call_operand.hbm [shape: f32[1,1], index: 2, kind: output, shape index: {}]  }
   0x1   :  { %8 = vsyncpa [#allocation7], 0 }
   0x2   :  { %9 = vsyncpa [#allocation5], 0  ;;  %s20_s11 = sshll.u32 %s269_s0, 4  ;;  %s236_s12 = smov [#allocation3]   ;;  %s21_s11 = int_to_ptr.hbm [resolvable:$true] %s20_s11 }
   0x3   :  { %s22_s13 = sshll.u32 %s236_s12, 4  ;;  %s36_s16 = sshll.u32 %s270_s1, 4  ;;  %s23_s13 = int_to_ptr.vmem [resolvable:$true] %s22_s13  ;;  %s37_s16 = int_to_ptr.hbm [resolvable:$true] %s36_s16 }
   0x4   :  { %25 = dma.hbm_to_vmem [thread:$0]  %s21_s11, 128, %s23_s13, [#allocation4]  }
   0x5   :  { %s237_s17 = smov [#allocation6]  }
   0x6   :  { %s38_s18 = sshll.u32 %s237_s17, 4  ;;  %s39_s18 = int_to_ptr.vmem [resolvable:$true] %s38_s18 }
   0x7   :  { %41 = dma.hbm_to_vmem [thread:$0]  %s37_s16, 128, %s39_s18, [#allocation7]  }
   0x8   :  { %230 = dma.done.wait [#allocation4], 128  }
   0x9   :  { %231 = vsyncadd [#allocation4], 4294967168 }
   0xa   :  { %232 = dma.done.wait [#allocation7], 128  }
   0xb   :  { %233 = vsyncadd [#allocation7], 4294967168  ;;  %v64_v0 = vld [vmem:[#allocation6] sm:$0xff]  ;;  %vm66_vm0 = vcmask 261120   ;;  %v62_v2 = vld [vmem:[#allocation3] sm:$0xff]  ;;  %vm115_vm5 = vcmask 7168  }
   0xc   :  { %v65_v1 = vmul.f32 0.2, %v64_v0  ;;  %v63_v4 = vmul.f32 0.2, %v62_v2  ;;  %s141_s19 = sshll.u32 %s271_s2, 4  ;;  %s238_s22 = smov [#allocation8]   ;;  %s142_s19 = int_to_ptr.hbm [resolvable:$true] %s141_s19 }
   0xe   :  { %v67_v3 = vsel %vm66_vm0, %v65_v1, -inf  ;;  %v92_v5 = vsel %vm66_vm0, %v63_v4, -inf }
   0xf   :  { %68 = vmax.xlane.f32.xlu0 %v67_v3 }
  0x17   :  { %93 = vmax.xlane.f32.xlu0 %v92_v5 }
  0x82   :  { %v69_v6 = vpop.xlane.xlu0 %68 }
  0x83   :  { %v70_v7 = vsub.f32 %v65_v1, %v69_v6 }
  0x85   :  { %v71_v8 = vmul.f32 1.442695, %v70_v7 }
  0x87   :  { %162 = vpow2.f32 %v71_v8 }
  0x8a   :  { %v94_v9 = vpop.xlane.xlu0 %93 }
  0x8b   :  { %v95_v10 = vsub.f32 %v63_v4, %v94_v9 }
  0x8d   :  { %v163_v11 = vpop.eup %162  ;;  %v96_v12 = vmul.f32 1.442695, %v95_v10 }
  0x8e   :  { %v73_v13 = vsel %vm66_vm0, %v163_v11, 0.0 }
  0x8f   :  { %164 = vpow2.f32 %v96_v12  ;;  %74 = vadd.xlane.f32.xlu1 %v73_v13 }
  0x95   :  { %v165_v14 = vpop.eup %164 }
  0x96   :  { %v98_v15 = vsel %vm66_vm0, %v165_v14, 0.0 }
  0x97   :  { %99 = vadd.xlane.f32.xlu1 %v98_v15 }
 0x102   :  { %v75_v16 = vpop.xlane.xlu1 %74 }
 0x103   :  { %166 = vrcp.f32 %v75_v16  ;;  %v87_v21 = vand.u32 2147483648, %v75_v16  ;;  %v85_v23 = vand.u32 2147483647, %v75_v16  ;;  %vm81_vm2 = vweird.f32 %v75_v16 }
 0x105   :  { %v88_v26 = vor.u32 1.1754944e-38, %v87_v21  ;;  %vm86_vm4 = vcmp.eq.f32.partialorder %v85_v23, 8.507059e+37 }
 0x109   :  { %v167_v17 = vpop.eup %166 }
 0x10a   :  { %v77_v18 = vmul.f32 %v167_v17, %v75_v16  ;;  %v100_v19 = vpop.xlane.xlu1 %99  ;;  %vm82_vm1 = vweird.f32 %v167_v17 }
 0x10b   :  { %168 = vlog2.f32 %v100_v19  ;;  %vm83_vm3 = vmor %vm81_vm2, %vm82_vm1 }
 0x10c   :  { %v78_v20 = vsub.f32 1.0, %v77_v18 }
 0x10e   :  { %v79_v22 = vmul.f32 %v167_v17, %v78_v20 }
 0x110   :  { %v80_v24 = vadd.f32 %v167_v17, %v79_v22 }
 0x111   :  { %v169_v25 = vpop.eup %168 }
 0x112   :  { %v102_v27 = vmul.f32 0.6931472, %v169_v25  ;;  %v84_v28 = vsel %vm83_vm3, %v167_v17, %v80_v24 }
 0x113   :  { %v89_v29 = vsel %vm86_vm4, %v88_v26, %v84_v28 }
 0x114   :  { %v103_v30 = vsub.f32 %v102_v27, %v95_v10  ;;  %v91_v32 = vmul.f32 %v163_v11, %v89_v29 }
 0x116   :  { %v108_v31 = vsel %vm66_vm0, %v103_v30, 0.0  ;;  %v104_v33 = vmul.f32 %v103_v30, %v91_v32 }
 0x117   :  { %109 = vadd.xlane.f32.xlu2 %v108_v31 }
 0x118   :  { %v105_v34 = vsel %vm66_vm0, %v104_v33, 0.0 }
 0x11f   :  { %106 = vadd.xlane.f32.xlu2 %v105_v34 }
 0x18a   :  { %v110_v35 = vpop.xlane.xlu2 %109 }
 0x18b   :  { %v111_v36 = vmul.f32 1e-07, %v110_v35 }
 0x192   :  { %v107_v37 = vpop.xlane.xlu2 %106 }
 0x193   :  { %v112_v38 = vadd.f32 %v111_v36, %v107_v37 }
 0x195   :  { %v113_v39 = vadd.f32 1.0000032e-07, %v112_v38 }
 0x197   :  { %v116_v40 = vsel %vm115_vm5, %v113_v39, 0.0 }
 0x198   :  { %117 = vadd.xlane.f32.xlu0 %v116_v40 }
 0x20b   :  { %v118_v41 = vpop.xlane.xlu0 %117 }
 0x20c   :  { %v119_v42 = vrot.slane %v118_v41, 4 }
 0x20e   :  { %v120_v43 = vadd.f32 %v119_v42, %v118_v41 }
 0x210   :  { %v121_v44 = vrot.slane %v120_v43, 2 }
 0x212   :  { %v122_v45 = vadd.f32 %v121_v44, %v120_v43 }
 0x214   :  { %v123_v46 = vrot.slane %v122_v45, 1 }
 0x216   :  { %v124_v47 = vadd.f32 %v123_v46, %v122_v45 }
 0x218   :  { %157 = vpush %v124_v47 }
 0x249   :  { %s158_s20 = spop %157 }
 0x24a   :  { %s133_s21 = smul.f32 0.125, %s158_s20 }
 0x24c   :  { %135 = sst [smem:[#allocation8]] %s133_s21 }
 0x24d   :  { %144 = dma.smem_to_hbm %s238_s22, 16, %s142_s19, [#allocation5]  }
 0x24e   :  { %234 = dma.done.wait [#allocation5], 16  }
 0x24f   :  { %235 = vsyncadd [#allocation5], 4294967280 }
 0x250   :  { %149 = sfence }
 0x251   :  { %150 = vsyncpa [#allocation4], 1 }
 0x252   :  { %151 = vsyncpa [#allocation7], 1 }
 0x253   :  { %152 = vsyncpa [#allocation5], 1 }

</bundles_post_ra>
